<compile_context>
chip_gen: v7x
topology: tpu7x:2x2x1
jax: 0.10.0
libtpu: 0.0.40
codegen_flags: <defaults>
</compile_context>

<pallas_src>
import functools

import jax
import jax.numpy as jnp
from jax.experimental import pallas as pl
from jax.experimental.pallas import tpu as pltpu


def _act(v, leak):
    if leak > 0.0:
        return jnp.where(v > 0, v, leak * v)
    return jnp.maximum(v, 0.0)


def _conv1_kernel(T1, C, K, stride, n1_ref, xph_ref, w1_ref, lr_ref, st1_ref):
    """conv1 (C -> 2C, stride) as K bf16 tap GEMMs + masked partial BN1 stats.

    xph_ref: (stride, Tp_s, C) bf16  phase-decomposed padded input (one batch)
    w1_ref : (K, C, 2C) bf16
    lr_ref : (T1, 2C) f32            conv1 output for this batch
    st1_ref: (2, 2C) f32             row0 = sum(lr*m), row1 = sum(lr^2*m)
    """
    b = pl.program_id(0)
    n1 = n1_ref[b]

    acc = jnp.zeros((T1, 2 * C), jnp.float32)
    for k in range(K):                                   # static, small K
        tap = xph_ref[k % stride, (k // stride):(k // stride) + T1, :]
        acc = acc + jnp.dot(tap, w1_ref[k], preferred_element_type=jnp.float32)

    mask = (jax.lax.broadcasted_iota(jnp.int32, (T1, 1), 0) < n1).astype(jnp.float32)
    lr_ref[...] = acc
    lm = acc * mask
    st1_ref[0:1, :] = jnp.sum(lm, axis=0, keepdims=True)
    st1_ref[1:2, :] = jnp.sum(lm * acc, axis=0, keepdims=True)


def _conv2_kernel(T1, C, K, leak, n1_ref, lr_ref, sc1_ref, sh1_ref, w2_ref,
                  l_ref, r2_ref, st2_ref, rpad_ref):
    """Fused BN1 (folded scale/shift) + act + conv2 + masked partial BN2 stats.

    lr_ref : (T1, 2C) f32, sc1/sh1: (1, 2C) f32, w2_ref: (K, C, C) bf16
    l_ref  : (T1, C) f32   left half (normalized, unmasked; masked at output)
    r2_ref : (T1, C) f32   conv2 output (pre-BN2)
    st2_ref: (2, C) f32    row0 = sum(r2*m), row1 = sum(r2^2*m)
    rpad_ref: (T1 + 2*(K//2), C) f32 VMEM scratch (edges zeroed only)
    """
    pad = K // 2
    b = pl.program_id(0)
    n1 = n1_ref[b]
    mask = (jax.lax.broadcasted_iota(jnp.int32, (T1, 1), 0) < n1).astype(jnp.float32)

    lrn = lr_ref[...] * sc1_ref[...] + sh1_ref[...]
    l_ref[...] = lrn[:, :C]
    r = _act(lrn[:, C:], leak) * mask                    # only r half masked

    if pad > 0:                                          # zero only pad edges
        rpad_ref[0:pad, :] = jnp.zeros((pad, C), jnp.float32)
        rpad_ref[pad + T1:, :] = jnp.zeros((pad, C), jnp.float32)
    rpad_ref[pad:pad + T1, :] = r

    acc = jnp.zeros((T1, C), jnp.float32)
    for k in range(K):                                   # static, small K
        tap = rpad_ref[k:k + T1, :].astype(jnp.bfloat16)
        acc = acc + jnp.dot(tap, w2_ref[k], preferred_element_type=jnp.float32)

    r2_ref[...] = acc
    am = acc * mask
    st2_ref[0:1, :] = jnp.sum(am, axis=0, keepdims=True)
    st2_ref[1:2, :] = jnp.sum(am * acc, axis=0, keepdims=True)


def _combine_kernel(T1, C, leak, n1_ref, l_ref, r2_ref, sc2_ref, sh2_ref, out_ref):
    """out = (l + act(BN2(r2))) * mask, with BN2 folded into scale/shift."""
    b = pl.program_id(0)
    n1 = n1_ref[b]
    mask = (jax.lax.broadcasted_iota(jnp.int32, (T1, 1), 0) < n1).astype(jnp.float32)
    r2n = r2_ref[...] * sc2_ref[...] + sh2_ref[...]
    out_ref[...] = ((l_ref[...] + _act(r2n, leak)) * mask).astype(out_ref.dtype)


def init_params(key, channels, kernel_size):
    C, K = channels, kernel_size
    k1, k2 = jax.random.split(key)
    scale = 1.0 / float(C * K) ** 0.5
    # conv1: torch weight [2C, C, K] stored as [K, C, 2C] with w1[k,c,co]=W[co,c,k]
    w1 = jax.random.uniform(k1, (K, C, 2 * C), jnp.float32, -scale, scale)
    # conv2: torch weight [C, C, K] stored as [K, C, C] with w2[k,c,co]=W[co,c,k]
    w2 = jax.random.uniform(k2, (K, C, C), jnp.float32, -scale, scale)
    g1 = jnp.ones((1, 2 * C), jnp.float32)
    b1 = jnp.zeros((1, 2 * C), jnp.float32)
    g2 = jnp.ones((1, C), jnp.float32)
    b2 = jnp.zeros((1, C), jnp.float32)
    return (w1, g1, b1, w2, g2, b2)


def block_forward(x, N, params, *, kernel_size, stride, leak=0.0, eps=1e-5):
    """x: (B, C, T) f32 NCW; N: (B,) int32 valid lengths. Returns ((B, C, T1), N1)."""
    B, C, T = x.shape
    K = kernel_size
    pad = K // 2
    w1, g1, b1, w2, g2, b2 = params

    Tp = T + 2 * pad
    T1 = (Tp - K) // stride + 1
    N1 = jnp.maximum((N + 2 * pad - K) // stride + 1, 0).astype(jnp.int32)

    # zero invalid positions (padded-batch convention), go channels-last, pad time
    valid_in = (jnp.arange(T)[None, :] < N[:, None]).astype(x.dtype)      # (B, T)
    xt = jnp.transpose(x, (0, 2, 1)) * valid_in[:, :, None]               # (B, T, C)
    xp = jnp.pad(xt, ((0, 0), (pad, pad), (0, 0)))                        # (B, Tp, C)

    # phase-decompose time so each strided conv1 tap is a contiguous slice
    Tp_r = ((Tp + stride - 1) // stride) * stride
    Tp_s = Tp_r // stride
    xp = jnp.pad(xp, ((0, 0), (0, Tp_r - Tp), (0, 0)))
    xph = xp.reshape(B, Tp_s, stride, C).transpose(0, 2, 1, 3)            # (B, s, Tp_s, C)
    xph = xph.astype(jnp.bfloat16)                                        # bf16 MXU + half DMA
    w1b = w1.astype(jnp.bfloat16)
    w2b = w2.astype(jnp.bfloat16)

    cparams = pltpu.CompilerParams(
        dimension_semantics=("parallel",),        # batch grid -> both TCs on v7x
        vmem_limit_bytes=32 * 1024 * 1024)

    # ---------------- pass 1: conv1 + partial BN1 stats ----------------
    lr, st1 = pl.pallas_call(
        functools.partial(_conv1_kernel, T1, C, K, stride),
        grid_spec=pltpu.PrefetchScalarGridSpec(
            num_scalar_prefetch=1,
            grid=(B,),
            in_specs=[
                pl.BlockSpec((None, stride, Tp_s, C), lambda b, n: (b, 0, 0, 0)),
                pl.BlockSpec((K, C, 2 * C), lambda b, n: (0, 0, 0)),
            ],
            out_specs=[
                pl.BlockSpec((None, T1, 2 * C), lambda b, n: (b, 0, 0)),
                pl.BlockSpec((None, 2, 2 * C), lambda b, n: (b, 0, 0)),
            ]),
        out_shape=(jax.ShapeDtypeStruct((B, T1, 2 * C), jnp.float32),
                   jax.ShapeDtypeStruct((B, 2, 2 * C), jnp.float32)),
        compiler_params=cparams,
    )(N1, xph, w1b)

    # masked BN statistics: tiny cross-batch reduce + fold affine into scale/shift
    cnt = jnp.maximum(jnp.sum(N1).astype(jnp.float32), 1.0)

    def _scale_shift(st, g, b_):
        s1 = jnp.sum(st[:, 0, :], axis=0)
        s2 = jnp.sum(st[:, 1, :], axis=0)
        mean = s1 / cnt
        var = jnp.maximum(s2 / cnt - mean * mean, 0.0)
        inv = jax.lax.rsqrt(var + eps)
        scale = g.reshape(-1) * inv
        shift = b_.reshape(-1) - mean * scale
        return scale[None, :], shift[None, :]

    sc1, sh1 = _scale_shift(st1, g1, b1)

    # -------- pass 2: BN1 + act + conv2 + partial BN2 stats --------
    l, r2, st2 = pl.pallas_call(
        functools.partial(_conv2_kernel, T1, C, K, leak),
        grid_spec=pltpu.PrefetchScalarGridSpec(
            num_scalar_prefetch=1,
            grid=(B,),
            in_specs=[
                pl.BlockSpec((None, T1, 2 * C), lambda b, n: (b, 0, 0)),
                pl.BlockSpec((1, 2 * C), lambda b, n: (0, 0)),
                pl.BlockSpec((1, 2 * C), lambda b, n: (0, 0)),
                pl.BlockSpec((K, C, C), lambda b, n: (0, 0, 0)),
            ],
            out_specs=[
                pl.BlockSpec((None, T1, C), lambda b, n: (b, 0, 0)),
                pl.BlockSpec((None, T1, C), lambda b, n: (b, 0, 0)),
                pl.BlockSpec((None, 2, C), lambda b, n: (b, 0, 0)),
            ],
            scratch_shapes=[pltpu.VMEM((T1 + 2 * pad, C), jnp.float32)]),
        out_shape=(jax.ShapeDtypeStruct((B, T1, C), jnp.float32),
                   jax.ShapeDtypeStruct((B, T1, C), jnp.float32),
                   jax.ShapeDtypeStruct((B, 2, C), jnp.float32)),
        compiler_params=cparams,
    )(N1, lr, sc1, sh1, w2b)

    sc2, sh2 = _scale_shift(st2, g2, b2)

    # -------- pass 3: BN2 + act + residual add + output mask --------
    out = pl.pallas_call(
        functools.partial(_combine_kernel, T1, C, leak),
        grid_spec=pltpu.PrefetchScalarGridSpec(
            num_scalar_prefetch=1,
            grid=(B,),
            in_specs=[
                pl.BlockSpec((None, T1, C), lambda b, n: (b, 0, 0)),
                pl.BlockSpec((None, T1, C), lambda b, n: (b, 0, 0)),
                pl.BlockSpec((1, C), lambda b, n: (0, 0)),
                pl.BlockSpec((1, C), lambda b, n: (0, 0)),
            ],
            out_specs=pl.BlockSpec((None, T1, C), lambda b, n: (b, 0, 0))),
        out_shape=jax.ShapeDtypeStruct((B, T1, C), jnp.float32),
        compiler_params=cparams,
    )(N1, l, r2, sc2, sh2)

    out = jnp.transpose(out, (0, 2, 1))                                   # (B, C, T1)
    return out, N1


if __name__ == "__main__":
    key = jax.random.PRNGKey(0)
    kx, kp = jax.random.split(key)

    B, C, T = 2, 4, 16
    kernel_size, stride = 3, 2

    x = jax.random.normal(kx, (B, C, T), jnp.float32)
    N = jnp.array([16, 12], jnp.int32)
    params = init_params(kp, C, kernel_size)

    y, N_out = block_forward(x, N, params, kernel_size=kernel_size, stride=stride)
    jax.block_until_ready(y)

    T1 = (T + 2 * (kernel_size // 2) - kernel_size) // stride + 1
    assert y.shape == (B, C, T1)
    assert N_out.shape == (B,)
    assert bool(jnp.all(jnp.isfinite(y)))
    print("KERNEL_OK")
</pallas_src>

<mosaic_0001>
module attributes {stable_mosaic.version = 11 : i64} {
  func.func @_conv1_kernel(%arg0: i32, %arg1: memref<2xi32, #tpu.memory_space<smem>>, %arg2: memref<1x2x9x4xbf16, #tpu.memory_space<vmem>>, %arg3: memref<3x4x8xbf16, #tpu.memory_space<vmem>>, %arg4: memref<1x8x8xf32, #tpu.memory_space<vmem>>, %arg5: memref<1x2x8xf32, #tpu.memory_space<vmem>>) attributes {dimension_semantics = [#tpu.dimension_semantics<parallel>], iteration_bounds = array<i64: 2>, scalar_prefetch = 1 : i64, scratch_operands = 0 : i64, tpu.core_type = #tpu.core_type<tc>, window_params = [{transform_indices = @transform_0, window_bounds = array<i64: 1, 2, 9, 4>}, {pipeline_mode = #tpu.pipeline_mode<synchronous>, transform_indices = @transform_1, window_bounds = array<i64: 3, 4, 8>}, {transform_indices = @transform_2, window_bounds = array<i64: 1, 8, 8>}, {transform_indices = @transform_3, window_bounds = array<i64: 1, 2, 8>}]} {
    %0 = arith.index_cast %arg0 : i32 to index
    %1 = memref.load %arg1[%0] : memref<2xi32, #tpu.memory_space<smem>>
    %cst = arith.constant 0.000000e+00 : f32
    %2 = vector.broadcast %cst : f32 to vector<8x8xf32>
    %c0 = arith.constant 0 : index
    %c0_0 = arith.constant 0 : index
    %c0_1 = arith.constant 0 : index
    %c0_2 = arith.constant 0 : index
    %3 = vector.load %arg2[%c0, %c0_0, %c0_1, %c0_2] : memref<1x2x9x4xbf16, #tpu.memory_space<vmem>>, vector<1x1x8x4xbf16>
    %4 = vector.shape_cast %3 : vector<1x1x8x4xbf16> to vector<8x4xbf16>
    %c0_3 = arith.constant 0 : index
    %c0_4 = arith.constant 0 : index
    %c0_5 = arith.constant 0 : index
    %5 = vector.load %arg3[%c0_3, %c0_4, %c0_5] : memref<3x4x8xbf16, #tpu.memory_space<vmem>>, vector<1x4x8xbf16>
    %6 = vector.shape_cast %5 : vector<1x4x8xbf16> to vector<4x8xbf16>
    %cst_6 = arith.constant dense<0.000000e+00> : vector<8x8xf32>
    %7 = tpu.matmul %4, %6, %cst_6 {dimension_numbers = #tpu.dot_dimension_numbers<[1], [0], [0], [1], [0, 0, 1, 1], [], []>} : vector<8x4xbf16>, vector<4x8xbf16>, vector<8x8xf32> -> vector<8x8xf32>
    %8 = arith.addf %2, %7 : vector<8x8xf32>
    %c0_7 = arith.constant 0 : index
    %c1 = arith.constant 1 : index
    %c0_8 = arith.constant 0 : index
    %c0_9 = arith.constant 0 : index
    %9 = vector.load %arg2[%c0_7, %c1, %c0_8, %c0_9] : memref<1x2x9x4xbf16, #tpu.memory_space<vmem>>, vector<1x1x8x4xbf16>
    %10 = vector.shape_cast %9 : vector<1x1x8x4xbf16> to vector<8x4xbf16>
    %c1_10 = arith.constant 1 : index
    %c0_11 = arith.constant 0 : index
    %c0_12 = arith.constant 0 : index
    %11 = vector.load %arg3[%c1_10, %c0_11, %c0_12] : memref<3x4x8xbf16, #tpu.memory_space<vmem>>, vector<1x4x8xbf16>
    %12 = vector.shape_cast %11 : vector<1x4x8xbf16> to vector<4x8xbf16>
    %cst_13 = arith.constant dense<0.000000e+00> : vector<8x8xf32>
    %13 = tpu.matmul %10, %12, %cst_13 {dimension_numbers = #tpu.dot_dimension_numbers<[1], [0], [0], [1], [0, 0, 1, 1], [], []>} : vector<8x4xbf16>, vector<4x8xbf16>, vector<8x8xf32> -> vector<8x8xf32>
    %14 = arith.addf %8, %13 : vector<8x8xf32>
    %c0_14 = arith.constant 0 : index
    %c0_15 = arith.constant 0 : index
    %c1_16 = arith.constant 1 : index
    %c0_17 = arith.constant 0 : index
    %15 = vector.load %arg2[%c0_14, %c0_15, %c1_16, %c0_17] : memref<1x2x9x4xbf16, #tpu.memory_space<vmem>>, vector<1x1x8x4xbf16>
    %16 = vector.shape_cast %15 : vector<1x1x8x4xbf16> to vector<8x4xbf16>
    %c2 = arith.constant 2 : index
    %c0_18 = arith.constant 0 : index
    %c0_19 = arith.constant 0 : index
    %17 = vector.load %arg3[%c2, %c0_18, %c0_19] : memref<3x4x8xbf16, #tpu.memory_space<vmem>>, vector<1x4x8xbf16>
    %18 = vector.shape_cast %17 : vector<1x4x8xbf16> to vector<4x8xbf16>
    %cst_20 = arith.constant dense<0.000000e+00> : vector<8x8xf32>
    %19 = tpu.matmul %16, %18, %cst_20 {dimension_numbers = #tpu.dot_dimension_numbers<[1], [0], [0], [1], [0, 0, 1, 1], [], []>} : vector<8x4xbf16>, vector<4x8xbf16>, vector<8x8xf32> -> vector<8x8xf32>
    %20 = arith.addf %14, %19 : vector<8x8xf32>
    %21 = tpu.iota {dimensions = array<i32: 0>} : vector<8x1xi32>
    %22 = vector.broadcast %1 : i32 to vector<8x1xi32>
    %23 = arith.cmpi slt, %21, %22 : vector<8x1xi32>
    %24 = arith.extui %23 : vector<8x1xi1> to vector<8x1xi32>
    %25 = arith.sitofp %24 : vector<8x1xi32> to vector<8x1xf32>
    %c0_21 = arith.constant 0 : index
    %c0_22 = arith.constant 0 : index
    %c0_23 = arith.constant 0 : index
    %26 = vector.load %arg4[%c0_21, %c0_22, %c0_23] : memref<1x8x8xf32, #tpu.memory_space<vmem>>, vector<1x8x8xf32>
    %27 = vector.shape_cast %26 : vector<1x8x8xf32> to vector<8x8xf32>
    %28 = vector.shape_cast %20 : vector<8x8xf32> to vector<1x8x8xf32>
    tpu.vector_store %arg4[%c0_21, %c0_22, %c0_23], %28 {strides = array<i32>} : memref<1x8x8xf32, #tpu.memory_space<vmem>>, vector<1x8x8xf32>,
    %29 = vector.broadcast %25 : vector<8x1xf32> to vector<8x8xf32>
    %30 = arith.mulf %20, %29 : vector<8x8xf32>
    %cst_24 = arith.constant dense<0.000000e+00> : vector<8xf32>
    %31 = vector.multi_reduction <add>, %30, %cst_24 [0] : vector<8x8xf32> to vector<8xf32>
    %32 = vector.shape_cast %31 : vector<8xf32> to vector<1x8xf32>
    %c0_25 = arith.constant 0 : index
    %c0_26 = arith.constant 0 : index
    %c0_27 = arith.constant 0 : index
    %33 = vector.load %arg5[%c0_25, %c0_26, %c0_27] : memref<1x2x8xf32, #tpu.memory_space<vmem>>, vector<1x1x8xf32>
    %34 = vector.shape_cast %33 : vector<1x1x8xf32> to vector<1x8xf32>
    %35 = vector.shape_cast %32 : vector<1x8xf32> to vector<1x1x8xf32>
    tpu.vector_store %arg5[%c0_25, %c0_26, %c0_27], %35 {strides = array<i32>} : memref<1x2x8xf32, #tpu.memory_space<vmem>>, vector<1x1x8xf32>,
    %36 = arith.mulf %30, %20 : vector<8x8xf32>
    %cst_28 = arith.constant dense<0.000000e+00> : vector<8xf32>
    %37 = vector.multi_reduction <add>, %36, %cst_28 [0] : vector<8x8xf32> to vector<8xf32>
    %38 = vector.shape_cast %37 : vector<8xf32> to vector<1x8xf32>
    %c0_29 = arith.constant 0 : index
    %c1_30 = arith.constant 1 : index
    %c0_31 = arith.constant 0 : index
    %39 = vector.load %arg5[%c0_29, %c1_30, %c0_31] : memref<1x2x8xf32, #tpu.memory_space<vmem>>, vector<1x1x8xf32>
    %40 = vector.shape_cast %39 : vector<1x1x8xf32> to vector<1x8xf32>
    %41 = vector.shape_cast %38 : vector<1x8xf32> to vector<1x1x8xf32>
    tpu.vector_store %arg5[%c0_29, %c1_30, %c0_31], %41 {strides = array<i32>} : memref<1x2x8xf32, #tpu.memory_space<vmem>>, vector<1x1x8xf32>,
    return
  }
  func.func @transform_0(%arg0: i32, %arg1: memref<2xi32, #tpu.memory_space<smem>>) -> (i32, i32, i32, i32) {
    %c0_i32 = arith.constant 0 : i32
    %c0_i32_0 = arith.constant 0 : i32
    %c0_i32_1 = arith.constant 0 : i32
    %c0_i32_2 = arith.constant 0 : i32
    return %arg0, %c0_i32, %c0_i32_0, %c0_i32_1 : i32, i32, i32, i32
  }
  func.func @transform_1(%arg0: i32, %arg1: memref<2xi32, #tpu.memory_space<smem>>) -> (i32, i32, i32) {
    %c0_i32 = arith.constant 0 : i32
    %c0_i32_0 = arith.constant 0 : i32
    %c0_i32_1 = arith.constant 0 : i32
    %c0_i32_2 = arith.constant 0 : i32
    return %c0_i32, %c0_i32_0, %c0_i32_1 : i32, i32, i32
  }
  func.func @transform_2(%arg0: i32, %arg1: memref<2xi32, #tpu.memory_space<smem>>) -> (i32, i32, i32) {
    %c0_i32 = arith.constant 0 : i32
    %c0_i32_0 = arith.constant 0 : i32
    %c0_i32_1 = arith.constant 0 : i32
    return %arg0, %c0_i32, %c0_i32_0 : i32, i32, i32
  }
  func.func @transform_3(%arg0: i32, %arg1: memref<2xi32, #tpu.memory_space<smem>>) -> (i32, i32, i32) {
    %c0_i32 = arith.constant 0 : i32
    %c0_i32_0 = arith.constant 0 : i32
    %c0_i32_1 = arith.constant 0 : i32
    return %arg0, %c0_i32, %c0_i32_0 : i32, i32, i32
  }
}

</mosaic_0001>

<bundles_post_ra>
// kernel: tpu_custom_call.1
= control target key start
LH: loop header
LB: loop body
LE: loop exit
PB: predicated region body
PF: predicated region fallthrough
CT: control target
= control target key end

     0   :  { %s899_s0 = inlined_call_operand.vmem [shape: s32[2], index: 0, kind: input, shape index: {}]   ;;  %s900_s1 = inlined_call_operand.vmem [shape: bf16[2,2,9,4], index: 1, kind: input, shape index: {}]   ;;  %s901_s2 = inlined_call_operand.vmem [shape: bf16[3,4,8], index: 2, kind: input, shape index: {}]   ;;  %s902_s3 = inlined_call_operand.hbm [shape: f32[2,8,8], index: 3, kind: output, shape index: {0}]   ;;  %s903_s4 = inlined_call_operand.hbm [shape: f32[2,2,8], index: 4, kind: output, shape index: {1}]  }
   0x1   :  { %s10_s17 = sshll.u32 %s899_s0, 4  ;;  %s11_s17 = int_to_ptr.vmem [resolvable:$true] %s10_s17 }
   0x2   :  { %s602_s18 = scalar_lea.vmem %s11_s17, 16  ;;  %p607_p1 = scmp.lt.s32.totalorder %s11_s17, %s11_s17 }
   0x3   :  { %p603_p0 = scmp.ne.s32.totalorder %s11_s17, %s602_s18  ;;  %p608_p2 = scmp.lt.s32.totalorder %s602_s18, %s602_s18 }
   0x5   :  { %p609_p3 = por %p608_p2, %p607_p1 }
   0x7   :  { %p610_p4 = pnand %p609_p3, %p603_p0 }
   0x9   :  { %613 = shalt.err (!%p610_p4)  }
   0xa   :  { %s712_s19 = smov [#allocation3]  }
   0xb   :  { %13 = dma.vmem_to_smem %s11_s17, 16, %s712_s19, [#allocation2] }
   0xc   :  { %686 = dma.done.wait [#allocation2], 16 }
   0xd   :  { %687 = vsyncadd [#allocation2], 4294967280 }
   0xe   :  { %15 = sfence }
   0xf   :  { %16 = vsyncpa [#allocation5], 0 }
  0x10   :  { %18 = vsyncpa [#allocation5 + $0x1], 0 }
  0x11   :  { %19 = vsyncpa [#allocation7], 0 }
  0x12   :  { %21 = vsyncpa [#allocation7 + $0x1], 0  ;;  %s745_s20 = smov 0   ;;  %s747_s0 = smov 0  }
  0x13   :  { %s749_s21 = smov 0   ;;  %s751_s22 = smov 0  }
  0x14 LB: > { %s766_s23 = sadd.s32 4294967295, %s710_s22   ;;  %s502_s24 = sadd.s32 4294967294, %s710_s22   ;;  %s710_s22 = sphi %s751_s22, %s909_s22   ;;  %s706_s21 = sphi %s749_s21, %s908_s21   ;;  %s702_s0 = sphi %s747_s0, %s907_s0   ;;  %s698_s20 = sphi %s745_s20, %s906_s20  }
  0x15   : > { %s770_s25 = sadd.s32 1, %s710_s22   ;;  %s81_s26 = sadd.s32 1, %s706_s21 }
  0x16   : > { %s78_s27 = ssub.s32 %s710_s22, %s770_s25  ;;  %p91_p5 = scmp.ne.s32.totalorder %s706_s21, %s702_s0 }
  0x17   : > { %p79_p6 = scmp.eq.s32.totalorder %s78_s27, 0  ;;  %p92_p7 = scmp.eq.s32.totalorder %s766_s23, 1 }
  0x18   : > { %p97_p8 = scmp.ne.s32.totalorder %s702_s0, %s698_s20  ;;  %p98_p9 = scmp.eq.s32.totalorder %s502_s24, 1 }
  0x19   : > { %s781_s28 = scalar_select %p79_p6, %s706_s21, %s81_s26  }
  0x1a   : > { %p783_p10 = por %p92_p7, %p91_p5  ;;  %p787_p11 = por %p98_p9, %p97_p8 }
  0x1b   : > { %p505_p12 = scmp.ge.s32.totalorder %s710_s22, 1  ;;  %p153_p13 = scmp.lt.s32.totalorder %s710_s22, 3 }
  0x1d   : > { %p154_p0 = pnand %p505_p12, %p153_p13 }
  0x1e   : > { %v190_v0 = vld [vmem:[%s901_s2] sm:$0x3] (!%p154_p0)  ;;  %vm199_vm0 = vcmask (!%p154_p0), 1041408   ;;  %p182_p1 = scmp.lt.s32.totalorder (!%p154_p0), %s766_s23, 1  ;;  %v713_v1 = vmov (!%p154_p0), 0.0   ;;  %vm714_vm1 = vmmov (!%p154_p0), 0   ;;  %v352_v15 = vlaneseq (!%p154_p0) }
  0x1f   : > { %157 = sbr.rel (%p154_p0) target bundleno = 311 (0x137), region = 28  ;;  %537 = vmatprep.subr.bf16.mxu0 (!%p154_p0), %v713_v1  ;;  %v247_v2 = vsel (!%p154_p0), %vm199_vm0, %v190_v0, 0  ;;  %539 = vmatprep.mubr.msk.bf16.mxu0 (!%p154_p0), %vm714_vm1, %v713_v1  ;;  %v511_v3 = vld [vmem:[%s901_s2 + $0x2] sm:$0x3] (!%p154_p0)  ;;  %v514_v4 = vld [vmem:[%s901_s2 + $0x4] sm:$0x3] (!%p154_p0) }
  0x20   : > { %538 = vmatpush3.bf16.msra.mxu0 (!%p154_p0), %v247_v2  ;;  %531 = vmatprep.subr.bf16.mxu1 (!%p154_p0), %v713_v1  ;;  %v201_v5 = vsel (!%p154_p0), %vm199_vm0, %v511_v3, 0  ;;  %vm195_vm2 = vcmask (!%p154_p0), 31744   ;;  %v309_v6 = vsel (!%p154_p0), %vm199_vm0, %v514_v4, 0  ;;  %s188_s16 = sld [smem:[#allocation3 + %s766_s23]] (!%p154_p0)  ;;  %s815_s17 = sand.u32 (!%p154_p0), 1, %s702_s0   ;;  %v353_v19 = vshrl.u32 (!%p154_p0), %v352_v15, 7 }
  0x21   : > { %543 = vmatprep.subr.bf16.mxu0 (!%p154_p0), %v713_v1  ;;  %532 = vmatpush3.bf16.msra.mxu1 (!%p154_p0), %v201_v5  ;;  %s506_s18 = sshll.u32 (!%p154_p0), %s815_s17, 3  ;;  %s520_s19 = sshll.u32 (!%p154_p0), %s766_s23, 7  ;;  %vm358_vm4 = vcmask (!%p154_p0), 64512  }
  0x22   : > { %533 = vmatprep.mubr.msk.bf16.mxu1 (!%p154_p0), %vm714_vm1, %v713_v1  ;;  %s174_s24 = scalar_lea.vmem (!%p154_p0), [#allocation4], %s506_s18  ;;  %s822_s6 = scalar_lea.hbm (!%p154_p0), %s902_s3, %s520_s19 }
  0x23   : > { %s398_s26 = sshll.u32 (!%p154_p0), %s174_s24, 4  ;;  %s380_s7 = scalar_lea.sflag (!%p154_p0), [#allocation5], %s815_s17  ;;  %s824_s26 = int_to_ptr.vmem [resolvable:$true] %s398_s26 }
  0x24   : > { %s614_s8 = scalar_lea.vmem (!%p154_p0), %s824_s26, 128 }
  0x25   : > { %p615_p2 = scmp.ne.s32.totalorder (!%p154_p0), %s824_s26, %s614_s8 }
  0x26   : > { %s183_s9 = scalar_select %p182_p1, %s766_s23, 1  ;;  %v354_v20 = vstv %s188_s16 }
  0x27   : > { %vm355_vm3 = vcmp.lt.s32.totalorder %v353_v19, %v354_v20  ;;  %p616_p3 = pnand %p615_p2, %p783_p10 }
  0x28   : > { %s524_s12 = sshll.u32 %s183_s9, 4  ;;  %v517_v22 = vsel %vm355_vm3, 1.0, %v713_v1  ;;  %s715_s9 = smov [#allocation4]  }
  0x29   : > { %s186_s15 = scalar_lea.vmem %s900_s1, %s524_s12  ;;  %p617_p4 = pneg %p616_p3 }
  0x2a   : > { %v189_v7 = vld [vmem:[%s186_s15] sm:$0xf]  ;;  %v510_v9 = vld [vmem:[%s186_s15 + $0x8] sm:$0xf]  ;;  %s618_s10 = sshll.u32 %s715_s9, 4  ;;  %s619_s10 = int_to_ptr.vmem [resolvable:$false] %s618_s10 }
  0x2b   : > { %540 = vmatmul.mubr.msk.bf16.vlgmr.msra.gmra.mrb[0].mxu0 %vm195_vm2, %v189_v7  ;;  %v601_v8 = vld [vmem:[%s186_s15] sm:$0x1f]   ;;  %534 = vmatmul.mubr.msk.bf16.vlgmr.msra.gmra.mrb[0].mxu1 %vm195_vm2, %v510_v9  ;;  %s620_s11 = scalar_lea.vmem %s619_s10, 256  ;;  %p621_p5 = scmp.lt.s32.totalorder %s824_s26, %s619_s10 }
  0x2c   : > { %544 = vmatpush3.bf16.msra.mxu0 %v309_v6  ;;  %545 = vmatprep.mubr.msk.bf16.mxu0 %vm714_vm1, %v713_v1  ;;  %v301_v10 = vshll.u32 %v601_v8, 16  ;;  %v299_v11 = vshrl.u32 %v601_v8, 16  ;;  %p622_p6 = scmp.lt.s32.totalorder %s620_s11, %s614_s8 }
  0x2e   : > { %v303_v12 = vrot.slane %v301_v10, 1  ;;  %p623_p7 = por %p622_p6, %p621_p5 }
  0x30   : > { %v304_v13 = vor.u32 %v303_v12, %v299_v11  ;;  %p624_p8 = pnand %p623_p7, %p617_p4 }
  0x37   : > { %546 = vmatmul.mubr.msk.bf16.vlgmr.msra.gmra.mrb[0].mxu0 %vm195_vm2, %v304_v13 }
  0xfe   : > { %v237_v14 = vpop.f32.mrb[0].mxu1 }
  0xff   : > { %v535_v16 = vpop.f32.mrb[1].mxu1 }
 0x100   : > { %v240_v17 = vpop.f32.mrb[2].mxu1 }
 0x101   : > { %v536_v18 = vpop.f32.mrb[3].mxu1 }
 0x10a   : > { %v345_v21 = vpop.f32.mrb[0].mxu0 }
 0x10b   : > { %v549_v23 = vadd.f32 %v345_v21, %v237_v14  ;;  %v547_v24 = vpop.f32.mrb[1].mxu0 }
 0x10c   : > { %v348_v25 = vpop.f32.mrb[2].mxu0 }
 0x10d   : > { %v360_v26 = vmul.f32 %v549_v23, %v517_v22  ;;  %v548_v27 = vpop.f32.mrb[3].mxu0  ;;  %359 = vst.msk [vmem:[%s174_s24] sm:$0xff] %vm358_vm4, %v549_v23 }
 0x10e   : > { %627 = shalt.err (!%p624_p8)
}
 0x10f   : > { %s628_s12 = scalar_lea.hbm %s822_s6, 128  ;;  %s632_s15 = scalar_lea.hbm %s902_s3, 256 }
 0x110   : > { %p629_p9 = scmp.ne.s32.totalorder %s822_s6, %s628_s12  ;;  %p633_p0 = scmp.lt.u32.totalorder %s822_s6, %s902_s3 }
 0x111   : > { %p634_p1 = scmp.lt.u32.totalorder %s632_s15, %s628_s12  ;;  %p636_p3 = scmp.lt.u32.totalorder %s628_s12, %s822_s6 }
 0x112   : > { %p630_p12 = pnand %p629_p9, %p783_p10 }
 0x113   : > { %p635_p2 = por %p634_p1, %p633_p0 }
 0x114   : > { %p631_p13 = pneg %p630_p12 }
 0x115   : > { %p637_p4 = por %p636_p3, %p635_p2 }
 0x117   : > { %p638_p5 = pnand %p637_p4, %p631_p13 }
 0x119   : > { %641 = shalt.err (!%p638_p5)
}
 0x11a   : > { %554 = dma.vmem_to_hbm [thread:$0]  (%p783_p10), %s824_s26, 128, %s822_s6, %s380_s7   ;;  %v370_v28 = vmul.f32 %v549_v23, %v360_v26  ;;  %v361_v29 = vsel %vm358_vm4, %v360_v26, 0.0  ;;  %vm368_vm5 = vcmask 57344  }
 0x11b   : > { %v362_v30 = vrot.slane %v361_v29, 4  ;;  %s507_s19 = sshll.u32 %s815_s17, 1  ;;  %s521_s24 = sshll.u32 %s766_s23, 5 }
 0x11c   : > { %v371_v31 = vsel %vm358_vm4, %v370_v28, 0.0  ;;  %s181_s26 = scalar_lea.vmem [#allocation6], %s507_s19  ;;  %s856_s7 = scalar_lea.hbm %s903_s4, %s521_s24 }
 0x11d   : > { %v363_v32 = vadd.f32 %v362_v30, %v361_v29  ;;  %v372_v33 = vrot.slane %v371_v31, 4  ;;  %s411_s27 = sshll.u32 %s181_s26, 4  ;;  %s385_s8 = scalar_lea.sflag [#allocation7], %s815_s17  ;;  %s858_s27 = int_to_ptr.vmem [resolvable:$true] %s411_s27 }
 0x11e   : > { %s642_s9 = scalar_lea.vmem %s858_s27, 32  ;;  %s716_s23 = smov [#allocation6]  }
 0x11f   : > { %v364_v34 = vrot.slane %v363_v32, 2  ;;  %v373_v35 = vadd.f32 %v372_v33, %v371_v31  ;;  %p643_p6 = scmp.ne.s32.totalorder %s858_s27, %s642_s9  ;;  %s646_s10 = sshll.u32 %s716_s23, 4  ;;  %s647_s10 = int_to_ptr.vmem [resolvable:$false] %s646_s10 }
 0x120   : > { %s648_s11 = scalar_lea.vmem %s647_s10, 64  ;;  %p649_p9 = scmp.lt.s32.totalorder %s858_s27, %s647_s10 }
 0x121   : > { %v365_v36 = vadd.f32 %v364_v34, %v363_v32  ;;  %v374_v37 = vrot.slane %v373_v35, 2  ;;  %p644_p7 = pnand %p643_p6, %p783_p10  ;;  %p650_p12 = scmp.lt.s32.totalorder %s648_s11, %s642_s9 }
 0x123   : > { %v375_v38 = vadd.f32 %v374_v37, %v373_v35  ;;  %v366_v39 = vrot.slane %v365_v36, 1  ;;  %p645_p8 = pneg %p644_p7  ;;  %p651_p13 = por %p650_p12, %p649_p9 }
 0x125   : > { %v367_v40 = vadd.f32 %v366_v39, %v365_v36  ;;  %v376_v41 = vrot.slane %v375_v38, 1  ;;  %p652_p0 = pnand %p651_p13, %p645_p8 }
 0x127   : > { %369 = vst.msk [vmem:[%s181_s26] sm:$0x1] %vm368_vm5, %v367_v40  ;;  %v377_v42 = vadd.f32 %v376_v41, %v375_v38 }
 0x129   : > { %378 = vst.msk [vmem:[%s181_s26 + $0x1] sm:$0x1] %vm368_vm5, %v377_v42 }
 0x12a   : > { %655 = shalt.err (!%p652_p0)
}
 0x12b   : > { %s656_s17 = scalar_lea.hbm %s856_s7, 32  ;;  %s660_s14 = scalar_lea.hbm %s903_s4, 64 }
 0x12c   : > { %p657_p1 = scmp.ne.s32.totalorder %s856_s7, %s656_s17  ;;  %p661_p4 = scmp.lt.u32.totalorder %s856_s7, %s903_s4 }
 0x12d   : > { %p662_p5 = scmp.lt.u32.totalorder %s660_s14, %s656_s17  ;;  %p664_p7 = scmp.lt.u32.totalorder %s656_s17, %s856_s7 }
 0x12e   : > { %p658_p2 = pnand %p657_p1, %p783_p10 }
 0x12f   : > { %p663_p6 = por %p662_p5, %p661_p4 }
 0x130   : > { %p659_p3 = pneg %p658_p2 }
 0x131   : > { %p665_p8 = por %p664_p7, %p663_p6 }
 0x133   : > { %p666_p9 = pnand %p665_p8, %p659_p3 }
 0x135   : > { %669 = shalt.err (!%p666_p9)
}
 0x136   : > { %555 = dma.vmem_to_hbm [thread:$0]  (%p783_p10), %s858_s27, 32, %s856_s7, %s385_s8  }
 0x137 PF: > { %p565_p12 = scmp.ge.s32.totalorder %s710_s22, 2  ;;  %s423_s18 = sand.u32 1, %s698_s20  }
 0x138   : > { %s424_s19 = scalar_lea.sflag [#allocation5], %s423_s18 }
 0x139   : > { %p559_p13 = pnand %p565_p12, %p787_p11 }
 0x13b   : > { %689 = dma.done.wait (!%p559_p13), %s424_s19, 128  }
 0x13c   : > { %691 = vsyncadd (!%p559_p13), %s424_s19, 4294967168  ;;  %s433_s24 = scalar_lea.sflag [#allocation7], %s423_s18 }
 0x13d   : > { %693 = dma.done.wait (!%p559_p13), %s433_s24, 32  }
 0x13e   : > { %695 = vsyncadd (!%p559_p13), %s433_s24, 4294967264  ;;  %p24_p10 = scmp.ge.s32.totalorder %s770_s25, 4   ;;  %s906_s20 = smov %s702_s0 }
 0x13f   : > { %s907_s0 = smov %s706_s21  ;;  %s908_s21 = smov %s781_s28 }
 0x140   : > { %s909_s22 = smov %s770_s25  ;;  %26 = sbr.rel (!%p24_p10) target bundleno = 20 (0x14), region = 83 }
 0x147   :  { %438 = vsyncpa [#allocation5], 1 }
 0x148   :  { %440 = vsyncpa [#allocation5 + $0x1], 1 }
 0x149   :  { %441 = vsyncpa [#allocation7], 1 }
 0x14a   :  { %443 = vsyncpa [#allocation7 + $0x1], 1 }

</bundles_post_ra>
